<compile_context>
chip_gen: v7x
topology: tpu7x:2x2x1
jax: 0.10.0
libtpu: 0.0.40
codegen_flags: <defaults>
</compile_context>

<pallas_src>
import jax
import jax.numpy as jnp
from jax.experimental import pallas as pl
from jax.experimental.pallas import tpu as pltpu


_LANES = 128
_MAX_TILE = 8192  # lanes per grid step (multiple of 128); 9*8192*4B ≈ 288 KiB per block


def _round_up(x, m):
    return ((x + m - 1) // m) * m


def _mse3_kernel(data_ref, o_ref):
    # data_ref: (9, tile) f32, rows:
    #   0: epspre  1: gmpre  2: gdpre
    #   3: epstar  4: gmtar  5: gdtar  6: gmvstar  7: gdvstar  8: idvstar
    # o_ref: (3, tile) f32 per-lane partial sums, resident across the grid.
    @pl.when(pl.program_id(0) == 0)
    def _init():
        o_ref[...] = jnp.zeros_like(o_ref)

    d = data_ref[...]
    eps, gm, gd = d[0:1, :], d[1:2, :], d[2:3, :]
    epstar, gmtar, gdtar = d[3:4, :], d[4:5, :], d[5:6, :]
    gmv, gdv, idv = d[6:7, :], d[7:8, :], d[8:9, :]

    r0 = eps - epstar
    r1 = gm * idv + gmv * eps - gmtar
    r2 = gd * idv + gdv * eps - gdtar

    o_ref[...] += jnp.concatenate([r0 * r0, r1 * r1, r2 * r2], axis=0)


@jax.jit
def mse3_loss(epspre, gmpre, gdpre, labels, a1, a2):
    """Pallas implementation of MSE3Loss.forward -> scalar f32 loss."""
    epspre = epspre.reshape(-1).astype(jnp.float32)
    gmpre = gmpre.reshape(-1).astype(jnp.float32)
    gdpre = gdpre.reshape(-1).astype(jnp.float32)
    labels = labels.astype(jnp.float32)
    b = epspre.shape[0]

    # Lane-dense slab: batch along lanes, padded to a multiple of the tile.
    tile = min(_round_up(b, _LANES), _MAX_TILE)
    bp = _round_up(b, tile)

    data = jnp.stack(
        [epspre, gmpre, gdpre,
         labels[:, 0], labels[:, 1], labels[:, 2],
         labels[:, 3], labels[:, 4], labels[:, 5]],
        axis=0)                                    # (9, B)
    if bp != b:
        data = jnp.pad(data, ((0, 0), (0, bp - b)))  # zeros contribute 0 to sums

    partial = pl.pallas_call(
        _mse3_kernel,
        out_shape=jax.ShapeDtypeStruct((3, tile), jnp.float32),
        grid=(bp // tile,),
        in_specs=[pl.BlockSpec((9, tile), lambda i: (0, i))],
        out_specs=pl.BlockSpec((3, tile), lambda i: (0, 0)),  # accumulator, resident
        compiler_params=pltpu.CompilerParams(
            dimension_semantics=("arbitrary",)),  # reduction axis
    )(data)

    # O(1) epilogue: 3-lane reduce + scalar combine (matches torch exactly).
    sums = jnp.sum(partial, axis=1)               # (3,)
    a1 = jnp.asarray(a1, jnp.float32)
    a2 = jnp.asarray(a2, jnp.float32)
    return (sums[0] + a1 * sums[1] + a2 * sums[2]) / (3.0 * b)


def _reference_loss(epspre, gmpre, gdpre, labels, a1, a2):
    """Pure-JAX transcription of the torch forward (including inner means)."""
    epstar, gmtar, gdtar = labels[:, 0], labels[:, 1], labels[:, 2]
    gmvstar, gdvstar, idvstar = labels[:, 3], labels[:, 4], labels[:, 5]
    inner1 = jnp.mean((gmpre * idvstar + gmvstar * epspre - gmtar) ** 2)
    inner2 = jnp.mean((gdpre * idvstar + gdvstar * epspre - gdtar) ** 2)
    return (1.0 / 3.0) * jnp.mean((epspre - epstar) ** 2 + a1 * inner1 + a2 * inner2)


if __name__ == "__main__":
    key = jax.random.PRNGKey(0)
    a1, a2 = 0.5, 0.25

    # One lane-aligned batch and one ragged batch (exercises the zero padding).
    for batch in (256, 37):
        k0, k1, k2, k3 = jax.random.split(jax.random.fold_in(key, batch), 4)
        epspre = jax.random.normal(k0, (batch,), jnp.float32)
        gmpre = jax.random.normal(k1, (batch,), jnp.float32)
        gdpre = jax.random.normal(k2, (batch,), jnp.float32)
        labels = jax.random.normal(k3, (batch, 6), jnp.float32)

        loss = jax.block_until_ready(
            mse3_loss(epspre, gmpre, gdpre, labels, a1, a2))
        ref = _reference_loss(epspre, gmpre, gdpre, labels, a1, a2)

        assert loss.shape == (), loss.shape
        assert jnp.allclose(loss, ref, atol=1e-5, rtol=1e-5), (loss, ref)

    print("KERNEL_OK")
</pallas_src>

<mosaic_0001>
module attributes {stable_mosaic.version = 11 : i64} {
  func.func @_mse3_kernel(%arg0: i32, %arg1: memref<9x256xf32, #tpu.memory_space<vmem>>, %arg2: memref<3x256xf32, #tpu.memory_space<vmem>>) attributes {dimension_semantics = [#tpu.dimension_semantics<arbitrary>], iteration_bounds = array<i64: 1>, scalar_prefetch = 0 : i64, scratch_operands = 0 : i64, tpu.core_type = #tpu.core_type<tc>, window_params = [{transform_indices = @transform_0, window_bounds = array<i64: 9, 256>}, {pipeline_mode = #tpu.pipeline_mode<synchronous>, transform_indices = @transform_1, window_bounds = array<i64: 3, 256>}]} {
    %c0_i32 = arith.constant 0 : i32
    %0 = arith.cmpi eq, %arg0, %c0_i32 : i32
    %1 = arith.extui %0 : i1 to i32
    %c0_i32_0 = arith.constant 0 : i32
    %2 = arith.cmpi ne, %1, %c0_i32_0 : i32
    scf.if %2 {
      %cst = arith.constant 0.000000e+00 : f32
      %29 = vector.broadcast %cst : f32 to vector<3x256xf32>
      %c0_6 = arith.constant 0 : index
      %c0_7 = arith.constant 0 : index
      %30 = vector.load %arg2[%c0_6, %c0_7] : memref<3x256xf32, #tpu.memory_space<vmem>>, vector<3x256xf32>
      tpu.vector_store %arg2[%c0_6, %c0_7], %29 {strides = array<i32>} : memref<3x256xf32, #tpu.memory_space<vmem>>, vector<3x256xf32>,
    } else {
    }
    %c0 = arith.constant 0 : index
    %c0_1 = arith.constant 0 : index
    %3 = vector.load %arg1[%c0, %c0_1] : memref<9x256xf32, #tpu.memory_space<vmem>>, vector<9x256xf32>
    %4 = vector.extract_strided_slice %3 {offsets = [0, 0], sizes = [1, 256], strides = [1, 1]} : vector<9x256xf32> to vector<1x256xf32>
    %5 = vector.extract_strided_slice %3 {offsets = [1, 0], sizes = [1, 256], strides = [1, 1]} : vector<9x256xf32> to vector<1x256xf32>
    %6 = vector.extract_strided_slice %3 {offsets = [2, 0], sizes = [1, 256], strides = [1, 1]} : vector<9x256xf32> to vector<1x256xf32>
    %7 = vector.extract_strided_slice %3 {offsets = [3, 0], sizes = [1, 256], strides = [1, 1]} : vector<9x256xf32> to vector<1x256xf32>
    %8 = vector.extract_strided_slice %3 {offsets = [4, 0], sizes = [1, 256], strides = [1, 1]} : vector<9x256xf32> to vector<1x256xf32>
    %9 = vector.extract_strided_slice %3 {offsets = [5, 0], sizes = [1, 256], strides = [1, 1]} : vector<9x256xf32> to vector<1x256xf32>
    %10 = vector.extract_strided_slice %3 {offsets = [6, 0], sizes = [1, 256], strides = [1, 1]} : vector<9x256xf32> to vector<1x256xf32>
    %11 = vector.extract_strided_slice %3 {offsets = [7, 0], sizes = [1, 256], strides = [1, 1]} : vector<9x256xf32> to vector<1x256xf32>
    %12 = vector.extract_strided_slice %3 {offsets = [8, 0], sizes = [1, 256], strides = [1, 1]} : vector<9x256xf32> to vector<1x256xf32>
    %13 = arith.subf %4, %7 : vector<1x256xf32>
    %14 = arith.mulf %5, %12 : vector<1x256xf32>
    %15 = arith.mulf %10, %4 : vector<1x256xf32>
    %16 = arith.addf %14, %15 : vector<1x256xf32>
    %17 = arith.subf %16, %8 : vector<1x256xf32>
    %18 = arith.mulf %6, %12 : vector<1x256xf32>
    %19 = arith.mulf %11, %4 : vector<1x256xf32>
    %20 = arith.addf %18, %19 : vector<1x256xf32>
    %21 = arith.subf %20, %9 : vector<1x256xf32>
    %c0_2 = arith.constant 0 : index
    %c0_3 = arith.constant 0 : index
    %22 = vector.load %arg2[%c0_2, %c0_3] : memref<3x256xf32, #tpu.memory_space<vmem>>, vector<3x256xf32>
    %23 = arith.mulf %13, %13 : vector<1x256xf32>
    %24 = arith.mulf %17, %17 : vector<1x256xf32>
    %25 = arith.mulf %21, %21 : vector<1x256xf32>
    %26 = tpu.concatenate %23, %24, %25 in 0 : vector<1x256xf32>, vector<1x256xf32>, vector<1x256xf32> -> vector<3x256xf32>
    %27 = arith.addf %22, %26 : vector<3x256xf32>
    %c0_4 = arith.constant 0 : index
    %c0_5 = arith.constant 0 : index
    %28 = vector.load %arg2[%c0_4, %c0_5] : memref<3x256xf32, #tpu.memory_space<vmem>>, vector<3x256xf32>
    tpu.vector_store %arg2[%c0_4, %c0_5], %27 {strides = array<i32>} : memref<3x256xf32, #tpu.memory_space<vmem>>, vector<3x256xf32>,
    return
  }
  func.func @transform_0(%arg0: i32) -> (i32, i32) {
    %c0_i32 = arith.constant 0 : i32
    %c0_i32_0 = arith.constant 0 : i32
    return %c0_i32, %arg0 : i32, i32
  }
  func.func @transform_1(%arg0: i32) -> (i32, i32) {
    %c0_i32 = arith.constant 0 : i32
    %c0_i32_0 = arith.constant 0 : i32
    %c0_i32_1 = arith.constant 0 : i32
    return %c0_i32, %c0_i32_0 : i32, i32
  }
}

</mosaic_0001>

<bundles_post_ra>
// kernel: mse3_loss.1
= control target key start
LH: loop header
LB: loop body
LE: loop exit
PB: predicated region body
PF: predicated region fallthrough
CT: control target
= control target key end

     0   :  { %v95_v0 = vmov 0.0   ;;  %vm78_vm0 = vcmask 1040384   ;;  %vm81_vm1 = vcmask 1041408   ;;  %s127_s1 = inlined_call_operand.vmem [shape: f32[3,256], index: 1, kind: output, shape index: {}]   ;;  %s128_s0 = inlined_call_operand.vmem [shape: f32[9,256], index: 0, kind: input, shape index: {}]  }
   0x1   :  { %12 = vst [vmem:[%s127_s1] sm:$0x77] %v95_v0  ;;  %v13_v1 = vld [vmem:[%s128_s0] sm:$0xff]  ;;  %v14_v2 = vld [vmem:[%s128_s0 + $0x8] sm:$0xff]  ;;  %v15_v3 = vld [vmem:[%s128_s0 + $0x10] sm:$0x1] }
   0x2   :  { %v16_v4 = vld [vmem:[%s128_s0 + $0x18] sm:$0x1]  ;;  %v19_v5 = vrot.slane %v13_v1, 3  ;;  %v27_v6 = vrot.slane %v15_v3, 7  ;;  %v33_v7 = vrot.slane %v13_v1, 2  ;;  %v20_v8 = vrot.slane %v14_v2, 3 }
   0x3   :  { %v28_v9 = vrot.slane %v16_v4, 7  ;;  %v34_v10 = vrot.slane %v14_v2, 2  ;;  %v49_v11 = vrot.slane %v15_v3, 6  ;;  %v50_v14 = vrot.slane %v16_v4, 6 }
   0x4   :  { %v31_v12 = vmul.f32 %v27_v6, %v13_v1  ;;  %v37_v13 = vmul.f32 %v33_v7, %v13_v1  ;;  %v55_v18 = vrot.slane %v13_v1, 1  ;;  %v56_v19 = vrot.slane %v14_v2, 1 }
   0x5   :  { %v32_v15 = vmul.f32 %v28_v9, %v14_v2  ;;  %v38_v16 = vmul.f32 %v34_v10, %v14_v2  ;;  %v23_v20 = vsub.f32 %v13_v1, %v19_v5  ;;  %v24_v21 = vsub.f32 %v14_v2, %v20_v8 }
   0x6   :  { %v41_v17 = vrot.slane %v37_v13, 5  ;;  %v53_v23 = vmul.f32 %v49_v11, %v13_v1  ;;  %v54_v25 = vmul.f32 %v50_v14, %v14_v2  ;;  %v59_v26 = vmul.f32 %v55_v18, %v13_v1 }
   0x7   :  { %v42_v22 = vrot.slane %v38_v16, 5  ;;  %v60_v27 = vmul.f32 %v56_v19, %v14_v2  ;;  %v72_v33 = vmul.f32 %v23_v20, %v23_v20  ;;  %v73_v34 = vmul.f32 %v24_v21, %v24_v21 }
   0x8   :  { %v45_v24 = vadd.f32 %v41_v17, %v31_v12  ;;  %v63_v30 = vrot.slane %v59_v26, 5  ;;  %v71_v45 = vld [vmem:[%s127_s1] sm:$0x77] }
   0x9   :  { %v46_v28 = vadd.f32 %v42_v22, %v32_v15  ;;  %v64_v31 = vrot.slane %v60_v27, 5 }
   0xa   :  { %v47_v29 = vsub.f32 %v45_v24, %v19_v5  ;;  %v67_v35 = vadd.f32 %v63_v30, %v53_v23 }
   0xb   :  { %v48_v32 = vsub.f32 %v46_v28, %v20_v8  ;;  %v68_v36 = vadd.f32 %v64_v31, %v54_v25 }
   0xc   :  { %v74_v37 = vmul.f32 %v47_v29, %v47_v29  ;;  %v69_v39 = vsub.f32 %v67_v35, %v19_v5 }
   0xd   :  { %v75_v38 = vmul.f32 %v48_v32, %v48_v32  ;;  %v70_v40 = vsub.f32 %v68_v36, %v20_v8 }
   0xe   :  { %v79_v41 = vsel %vm78_vm0, %v72_v33, %v74_v37  ;;  %v76_v43 = vmul.f32 %v69_v39, %v69_v39 }
   0xf   :  { %v80_v42 = vsel %vm78_vm0, %v73_v34, %v75_v38  ;;  %v77_v44 = vmul.f32 %v70_v40, %v70_v40 }
  0x10   :  { %v82_v46 = vsel %vm81_vm1, %v79_v41, %v76_v43 }
  0x11   :  { %v83_v47 = vsel %vm81_vm1, %v80_v42, %v77_v44 }
  0x12   :  { %v86_v48 = vcombine.low %v82_v46, %v83_v47 }
  0x14   :  { %v88_v49 = vadd.f32 %v86_v48, %v71_v45 }
  0x16   :  { %89 = vst [vmem:[%s127_s1] sm:$0x77] %v88_v49 }

</bundles_post_ra>
